<compile_context>
chip_gen: v5e
topology: v5e:2x2
jax: 0.10.0
libtpu: 0.0.40
codegen_flags: <defaults>
</compile_context>

<pallas_src>
import functools

import jax
import jax.numpy as jnp
from jax import lax
from jax.experimental import pallas as pl
from jax.experimental.pallas import tpu as pltpu


def _round_up(x, m):
    return -(-x // m) * m


def _dice_kernel(p_ref, t_ref, out_ref, num_acc, den_acc, *,
                 smooth, power, rows_valid, tile_rows, need_mask):
    """Grid = (N, grid_r). Axis 0 = sample ("parallel"), axis 1 = row tiles of
    the flattened feature dim ("arbitrary" reduction, innermost).

    p_ref, t_ref : (1, tile_rows, 128) VMEM tiles of predict / target
    out_ref      : (1, 8, 128) output block, loss broadcast on the last step
    num_acc      : (8, 128) f32 scratch, lane/sublane-wise partial sum(p * t)
    den_acc      : (8, 128) f32 scratch, lane/sublane-wise partial sum(p^p + t^p)
    """
    j = pl.program_id(1)

    @pl.when(j == 0)
    def _():
        num_acc[...] = jnp.zeros_like(num_acc)
        den_acc[...] = jnp.zeros_like(den_acc)

    p = p_ref[0].astype(jnp.float32)   # (tile_rows, 128)
    t = t_ref[0].astype(jnp.float32)

    if need_mask:
        # Last (non-dividing) row tile: rows beyond `rows_valid` hold
        # unspecified data and must be zeroed before the sums.
        row_ids = lax.broadcasted_iota(jnp.int32, (tile_rows, 128), 0)
        remaining = rows_valid - j * tile_rows
        valid = row_ids < remaining
        p = jnp.where(valid, p, 0.0)
        t = jnp.where(valid, t, 0.0)

    pt = p * t
    if power == 2:
        dd = p * p + t * t
    else:
        dd = p ** power + t ** power

    # Pure VPU accumulation: collapse tile_rows -> 8 sublanes with vreg-wise
    # adds.  The full cross-lane/sublane (XLU) reduce is deferred to the
    # epilogue so it is off the critical path of the streaming loop.
    num_acc[...] += jnp.sum(pt.reshape(tile_rows // 8, 8, 128), axis=0)
    den_acc[...] += jnp.sum(dd.reshape(tile_rows // 8, 8, 128), axis=0)

    @pl.when(j == pl.num_programs(1) - 1)
    def _():
        num = jnp.sum(num_acc[...]) + smooth
        den = jnp.sum(den_acc[...]) + smooth
        loss = 1.0 - num / den
        out_ref[...] = jnp.broadcast_to(loss, out_ref.shape).astype(out_ref.dtype)


def binary_dice_loss(predict, target, *, smooth=1.0, power=2, reduction="mean",
                     target_block_bytes=1 << 20):
    """Pallas implementation of BinaryDiceLoss.forward."""
    assert predict.shape[0] == target.shape[0], \
        "predict & target batch size don't match"
    assert power > 0, "p must be > 0 (zero padding relies on 0**p == 0)"
    n = predict.shape[0]

    # Glue: flatten exactly like torch's .view(N, -1).
    p2 = predict.reshape(n, -1)
    t2 = target.reshape(n, -1)
    d = p2.shape[1]
    itemsize = p2.dtype.itemsize

    # Lay each sample out as rows of 128 lanes so sublanes are filled.
    r = _round_up(d, 128) // 128                       # 128-lane rows / sample
    # ~1 MiB per input block, rounded down to a multiple of 8 rows.
    tile_rows = max(8, (target_block_bytes // (128 * itemsize)) // 8 * 8)

    if r <= tile_rows:
        r_final = _round_up(r, 8)                      # one block, no mask
        tile_rows = r_final
        need_mask = False
    else:
        r_final = r
        need_mask = (r_final % tile_rows) != 0         # mask last partial tile

    d_final = r_final * 128
    if d_final != d:
        # Only when D is not already a multiple of 128 (or the input is tiny
        # and needs sublane padding); zero pad is sum-neutral for power > 0.
        p2 = jnp.pad(p2, ((0, 0), (0, d_final - d)))
        t2 = jnp.pad(t2, ((0, 0), (0, d_final - d)))

    # Row-major reshape is a free view (no HBM copy) when no pad was needed.
    p3 = p2.reshape(n, r_final, 128)
    t3 = t2.reshape(n, r_final, 128)
    grid_r = -(-r_final // tile_rows)

    kernel = functools.partial(
        _dice_kernel, smooth=float(smooth), power=power,
        rows_valid=r_final, tile_rows=tile_rows, need_mask=need_mask)

    cost = pl.CostEstimate(
        flops=6 * n * d_final,
        transcendentals=0,
        bytes_accessed=2 * n * d_final * itemsize + n * 8 * 128 * 4)

    out = pl.pallas_call(
        kernel,
        out_shape=jax.ShapeDtypeStruct((n, 8, 128), jnp.float32),
        grid_spec=pltpu.PrefetchScalarGridSpec(
            num_scalar_prefetch=0,
            grid=(n, grid_r),
            in_specs=[
                pl.BlockSpec((1, tile_rows, 128), lambda i, j: (i, j, 0)),
                pl.BlockSpec((1, tile_rows, 128), lambda i, j: (i, j, 0)),
            ],
            out_specs=pl.BlockSpec((1, 8, 128), lambda i, j: (i, 0, 0)),
            scratch_shapes=[
                pltpu.VMEM((8, 128), jnp.float32),
                pltpu.VMEM((8, 128), jnp.float32),
            ],
        ),
        compiler_params=pltpu.CompilerParams(
            dimension_semantics=("parallel", "arbitrary")),
        cost_estimate=cost,
    )(p3, t3)

    loss = out[:, 0, 0]                                # shape [N,]
    if reduction == "mean":
        return jnp.mean(loss)
    elif reduction == "sum":
        return jnp.sum(loss)
    elif reduction == "none":
        return loss
    else:
        raise Exception("Unexpected reduction {}".format(reduction))


def _reference(predict, target, smooth=1.0, power=2, reduction="mean"):
    n = predict.shape[0]
    p = predict.reshape(n, -1).astype(jnp.float32)
    t = target.reshape(n, -1).astype(jnp.float32)
    num = jnp.sum(p * t, axis=1) + smooth
    den = jnp.sum(p ** power + t ** power, axis=1) + smooth
    loss = 1.0 - num / den
    if reduction == "mean":
        return jnp.mean(loss)
    if reduction == "sum":
        return jnp.sum(loss)
    return loss


if __name__ == "__main__":
    key = jax.random.PRNGKey(0)
    k1, k2 = jax.random.split(key)

    # NCHW inputs, shape [N, C, H, W] = [2, 4, 16, 16]
    predict = jax.nn.sigmoid(
        jax.random.normal(k1, (2, 4, 16, 16), dtype=jnp.float32))
    target = (jax.random.uniform(k2, (2, 4, 16, 16)) > 0.5).astype(jnp.float32)

    out = binary_dice_loss(predict, target, smooth=1.0, power=2,
                           reduction="mean")
    out = jax.block_until_ready(out)

    ref = _reference(predict, target)
    assert jnp.allclose(out, ref, atol=1e-5, rtol=1e-5), (out, ref)

    # Also check per-sample ('none') reduction path.
    out_none = jax.block_until_ready(
        binary_dice_loss(predict, target, reduction="none"))
    ref_none = _reference(predict, target, reduction="none")
    assert jnp.allclose(out_none, ref_none, atol=1e-5, rtol=1e-5), \
        (out_none, ref_none)

    print("KERNEL_OK")
</pallas_src>

<mosaic_0001>
module attributes {stable_mosaic.version = 11 : i64} {
  func.func @_dice_kernel(%arg0: i32, %arg1: i32, %arg2: memref<1x8x128xf32, #tpu.memory_space<vmem>>, %arg3: memref<1x8x128xf32, #tpu.memory_space<vmem>>, %arg4: memref<1x8x128xf32, #tpu.memory_space<vmem>>, %arg5: memref<8x128xf32, #tpu.memory_space<vmem>>, %arg6: memref<8x128xf32, #tpu.memory_space<vmem>>) attributes {dimension_semantics = [#tpu.dimension_semantics<parallel>, #tpu.dimension_semantics<arbitrary>], iteration_bounds = array<i64: 2, 1>, scalar_prefetch = 0 : i64, scratch_operands = 2 : i64, tpu.core_type = #tpu.core_type<tc>, window_params = [{transform_indices = @transform_0, window_bounds = array<i64: 1, 8, 128>}, {transform_indices = @transform_1, window_bounds = array<i64: 1, 8, 128>}, {transform_indices = @transform_2, window_bounds = array<i64: 1, 8, 128>}]} {
    %c0_i32 = arith.constant 0 : i32
    %0 = arith.cmpi eq, %arg1, %c0_i32 : i32
    %1 = arith.extui %0 : i1 to i32
    %c0_i32_0 = arith.constant 0 : i32
    %2 = arith.cmpi ne, %1, %c0_i32_0 : i32
    scf.if %2 {
      %cst_17 = arith.constant 0.000000e+00 : f32
      %24 = vector.broadcast %cst_17 : f32 to vector<8x128xf32>
      %c0_18 = arith.constant 0 : index
      %c0_19 = arith.constant 0 : index
      %25 = vector.load %arg5[%c0_18, %c0_19] : memref<8x128xf32, #tpu.memory_space<vmem>>, vector<8x128xf32>
      tpu.vector_store %arg5[%c0_18, %c0_19], %24 {strides = array<i32>} : memref<8x128xf32, #tpu.memory_space<vmem>>, vector<8x128xf32>,
      %cst_20 = arith.constant 0.000000e+00 : f32
      %26 = vector.broadcast %cst_20 : f32 to vector<8x128xf32>
      %c0_21 = arith.constant 0 : index
      %c0_22 = arith.constant 0 : index
      %27 = vector.load %arg6[%c0_21, %c0_22] : memref<8x128xf32, #tpu.memory_space<vmem>>, vector<8x128xf32>
      tpu.vector_store %arg6[%c0_21, %c0_22], %26 {strides = array<i32>} : memref<8x128xf32, #tpu.memory_space<vmem>>, vector<8x128xf32>,
    } else {
    }
    %c0 = arith.constant 0 : index
    %c0_1 = arith.constant 0 : index
    %c0_2 = arith.constant 0 : index
    %3 = vector.load %arg2[%c0, %c0_1, %c0_2] : memref<1x8x128xf32, #tpu.memory_space<vmem>>, vector<1x8x128xf32>
    %4 = vector.shape_cast %3 : vector<1x8x128xf32> to vector<8x128xf32>
    %c0_3 = arith.constant 0 : index
    %c0_4 = arith.constant 0 : index
    %c0_5 = arith.constant 0 : index
    %5 = vector.load %arg3[%c0_3, %c0_4, %c0_5] : memref<1x8x128xf32, #tpu.memory_space<vmem>>, vector<1x8x128xf32>
    %6 = vector.shape_cast %5 : vector<1x8x128xf32> to vector<8x128xf32>
    %7 = arith.mulf %4, %6 : vector<8x128xf32>
    %8 = arith.mulf %4, %4 : vector<8x128xf32>
    %9 = arith.mulf %6, %6 : vector<8x128xf32>
    %10 = arith.addf %8, %9 : vector<8x128xf32>
    %c0_6 = arith.constant 0 : index
    %c0_7 = arith.constant 0 : index
    %11 = vector.load %arg5[%c0_6, %c0_7] : memref<8x128xf32, #tpu.memory_space<vmem>>, vector<8x128xf32>
    %12 = vector.shape_cast %7 : vector<8x128xf32> to vector<1x8x128xf32>
    %cst = arith.constant dense<0.000000e+00> : vector<8x128xf32>
    %13 = vector.multi_reduction <add>, %12, %cst [0] : vector<1x8x128xf32> to vector<8x128xf32>
    %14 = arith.addf %11, %13 : vector<8x128xf32>
    %c0_8 = arith.constant 0 : index
    %c0_9 = arith.constant 0 : index
    %15 = vector.load %arg5[%c0_8, %c0_9] : memref<8x128xf32, #tpu.memory_space<vmem>>, vector<8x128xf32>
    tpu.vector_store %arg5[%c0_8, %c0_9], %14 {strides = array<i32>} : memref<8x128xf32, #tpu.memory_space<vmem>>, vector<8x128xf32>,
    %c0_10 = arith.constant 0 : index
    %c0_11 = arith.constant 0 : index
    %16 = vector.load %arg6[%c0_10, %c0_11] : memref<8x128xf32, #tpu.memory_space<vmem>>, vector<8x128xf32>
    %17 = vector.shape_cast %10 : vector<8x128xf32> to vector<1x8x128xf32>
    %cst_12 = arith.constant dense<0.000000e+00> : vector<8x128xf32>
    %18 = vector.multi_reduction <add>, %17, %cst_12 [0] : vector<1x8x128xf32> to vector<8x128xf32>
    %19 = arith.addf %16, %18 : vector<8x128xf32>
    %c0_13 = arith.constant 0 : index
    %c0_14 = arith.constant 0 : index
    %20 = vector.load %arg6[%c0_13, %c0_14] : memref<8x128xf32, #tpu.memory_space<vmem>>, vector<8x128xf32>
    tpu.vector_store %arg6[%c0_13, %c0_14], %19 {strides = array<i32>} : memref<8x128xf32, #tpu.memory_space<vmem>>, vector<8x128xf32>,
    %c0_i32_15 = arith.constant 0 : i32
    %21 = arith.cmpi eq, %arg1, %c0_i32_15 : i32
    %22 = arith.extui %21 : i1 to i32
    %c0_i32_16 = arith.constant 0 : i32
    %23 = arith.cmpi ne, %22, %c0_i32_16 : i32
    scf.if %23 {
      %c0_17 = arith.constant 0 : index
      %c0_18 = arith.constant 0 : index
      %24 = vector.load %arg5[%c0_17, %c0_18] : memref<8x128xf32, #tpu.memory_space<vmem>>, vector<8x128xf32>
      %25 = vector.shape_cast %24 : vector<8x128xf32> to vector<1x8x128xf32>
      %cst_19 = arith.constant dense<0.000000e+00> : vector<1xf32>
      %26 = vector.multi_reduction <add>, %25, %cst_19 [1, 2] : vector<1x8x128xf32> to vector<1xf32>
      %27 = vector.shape_cast %26 : vector<1xf32> to vector<1x1x1xf32>
      %28 = vector.extract %27[0, 0, 0] : f32 from vector<1x1x1xf32>
      %cst_20 = arith.constant 1.000000e+00 : f32
      %29 = arith.addf %28, %cst_20 : f32
      %c0_21 = arith.constant 0 : index
      %c0_22 = arith.constant 0 : index
      %30 = vector.load %arg6[%c0_21, %c0_22] : memref<8x128xf32, #tpu.memory_space<vmem>>, vector<8x128xf32>
      %31 = vector.shape_cast %30 : vector<8x128xf32> to vector<1x8x128xf32>
      %cst_23 = arith.constant dense<0.000000e+00> : vector<1xf32>
      %32 = vector.multi_reduction <add>, %31, %cst_23 [1, 2] : vector<1x8x128xf32> to vector<1xf32>
      %33 = vector.shape_cast %32 : vector<1xf32> to vector<1x1x1xf32>
      %34 = vector.extract %33[0, 0, 0] : f32 from vector<1x1x1xf32>
      %cst_24 = arith.constant 1.000000e+00 : f32
      %35 = arith.addf %34, %cst_24 : f32
      %36 = arith.divf %29, %35 : f32
      %cst_25 = arith.constant 1.000000e+00 : f32
      %37 = arith.subf %cst_25, %36 : f32
      %38 = vector.broadcast %37 : f32 to vector<1x8x128xf32>
      %c0_26 = arith.constant 0 : index
      %c0_27 = arith.constant 0 : index
      %c0_28 = arith.constant 0 : index
      %39 = vector.load %arg4[%c0_26, %c0_27, %c0_28] : memref<1x8x128xf32, #tpu.memory_space<vmem>>, vector<1x8x128xf32>
      tpu.vector_store %arg4[%c0_26, %c0_27, %c0_28], %38 {strides = array<i32>} : memref<1x8x128xf32, #tpu.memory_space<vmem>>, vector<1x8x128xf32>,
    } else {
    }
    return
  }
  func.func @transform_0(%arg0: i32, %arg1: i32) -> (i32, i32, i32) {
    %c0_i32 = arith.constant 0 : i32
    %c0_i32_0 = arith.constant 0 : i32
    return %arg0, %arg1, %c0_i32 : i32, i32, i32
  }
  func.func @transform_1(%arg0: i32, %arg1: i32) -> (i32, i32, i32) {
    %c0_i32 = arith.constant 0 : i32
    %c0_i32_0 = arith.constant 0 : i32
    return %arg0, %arg1, %c0_i32 : i32, i32, i32
  }
  func.func @transform_2(%arg0: i32, %arg1: i32) -> (i32, i32, i32) {
    %c0_i32 = arith.constant 0 : i32
    %c0_i32_0 = arith.constant 0 : i32
    %c0_i32_1 = arith.constant 0 : i32
    return %arg0, %c0_i32, %c0_i32_0 : i32, i32, i32
  }
}

</mosaic_0001>

<bundles_post_ra>
// kernel: tpu_custom_call.1
= control target key start
LH: loop header
LB: loop body
LE: loop exit
PB: predicated region body
PF: predicated region fallthrough
CT: control target
= control target key end

     0   :  { %7 = vsyncpa [#allocation5], 0  ;;  %s789_s0 = inlined_call_operand.hbm [shape: f32[2,8,128], index: 0, kind: input, shape index: {}]   ;;  %s790_s1 = inlined_call_operand.hbm [shape: f32[2,8,128], index: 1, kind: input, shape index: {}]   ;;  %s791_s2 = inlined_call_operand.hbm [shape: f32[2,8,128], index: 2, kind: output, shape index: {}]  }
   0x1   :  { %9 = vsyncpa [#allocation5 + $0x1], 0 }
   0x2   :  { %10 = vsyncpa [#allocation8], 0 }
   0x3   :  { %12 = vsyncpa [#allocation8 + $0x1], 0 }
   0x4   :  { %13 = vsyncpa [#allocation6], 0 }
   0x5   :  { %15 = vsyncpa [#allocation6 + $0x1], 0  ;;  %s656_s9 = smov 0   ;;  %s658_s10 = smov 0  }
   0x6   :  { %s660_s11 = smov 0   ;;  %s662_s12 = smov 0  }
   0x7   :  { %s664_s13 = smov 0   ;;  %s666_s14 = smov 0  }
   0x8 LB: > { %s402_s15 = sadd.s32 4294967295, %s639_s14   ;;  %s403_s16 = sadd.s32 4294967294, %s639_s14   ;;  %s639_s14 = sphi %s666_s14, %s21_s14   ;;  %s635_s13 = sphi %s664_s13, %s800_s13   ;;  %s631_s12 = sphi %s662_s12, %s799_s12   ;;  %s627_s11 = sphi %s660_s11, %s798_s11   ;;  %s623_s10 = sphi %s658_s10, %s797_s10   ;;  %s619_s9 = sphi %s656_s9, %s796_s9  }
   0x9   : > { %s33_s17 = sadd.s32 1, %s635_s13  ;;  %s42_s18 = sadd.s32 1, %s627_s11 }
   0xa   : > { %p35_p0 = scmp.ge.s32.totalorder %s33_s17, 2  ;;  %p49_p1 = scmp.ne.s32.totalorder %s627_s11, %s623_s10 }
   0xb   : > { %p50_p2 = scmp.eq.s32.totalorder %s639_s14, 0  ;;  %p55_p3 = scmp.ne.s32.totalorder %s623_s10, %s619_s9 }
   0xc   : > { %s802_s17 = smov (%p35_p0, %s33_s17), 0  ;;  %p56_p5 = scmp.eq.s32.totalorder %s402_s15, 0 }
   0xd   : > { %p697_p4 = por %p50_p2, %p49_p1  ;;  %s37_s20 = ssub.s32 %s635_s13, %s802_s17 }
   0xe   : > { %p107_p6 = scmp.eq.s32.totalorder %s402_s15, 1  ;;  %p40_p7 = scmp.eq.s32.totalorder %s37_s20, 0 }
   0xf   : > { %p703_p8 = por %p56_p5, %p55_p3  ;;  %p113_p10 = scmp.eq.s32.totalorder %s403_s16, 1 }
  0x10   : > { %p707_p9 = por %p107_p6, %p49_p1  ;;  %p405_p12 = scmp.ge.s32.totalorder %s639_s14, 2 }
  0x11   : > { %s712_s23 = scalar_select %p40_p7, %s627_s11, %s42_s18  }
  0x12   : > { %p714_p11 = por %p113_p10, %p55_p3  ;;  %p441_p13 = scmp.lt.s32.totalorder %s639_s14, 2 }
  0x13   : > { %s133_s25 = sand.u32 1, %s627_s11   ;;  %s407_s27 = sshll.u32 %s635_s13, 3 }
  0x14   : > { %s406_s26 = sshll.u32 %s133_s25, 3  ;;  %s142_s30 = scalar_lea.hbm %s789_s0, %s407_s27 }
  0x15   : > { %s137_s3 = scalar_lea.vmem [#allocation4], %s406_s26  ;;  %s144_s5 = sshll.u32 %s142_s30, 4  ;;  %s145_s5 = int_to_ptr.hbm [resolvable:$true] %s144_s5 }
  0x16   : > { %s146_s4 = sshll.u32 %s137_s3, 4  ;;  %p431_p0 = pnand %p441_p13, %p697_p4  ;;  %s147_s4 = int_to_ptr.vmem [resolvable:$true] %s146_s4 }
  0x17   : > { %p410_p1 = scmp.ge.s32.totalorder %s639_s14, 1  ;;  %p171_p2 = scmp.lt.s32.totalorder %s639_s14, 3 }
  0x18   : > { %s134_s6 = scalar_lea.sflag [#allocation5], %s133_s25  ;;  %s162_s15 = scalar_lea.hbm %s790_s1, %s407_s27 }
  0x19   : > { %433 = dma.hbm_to_vmem [thread:$0]  (!%p431_p0), %s145_s5, 128, %s147_s4, %s134_s6  }
  0x1a   : > { %p172_p3 = pnand %p410_p1, %p171_p2  ;;  %s157_s16 = scalar_lea.vmem [#allocation7], %s406_s26 }
  0x1b   : > { %s166_s18 = sshll.u32 %s157_s16, 4  ;;  %s164_s20 = sshll.u32 %s162_s15, 4  ;;  %s167_s18 = int_to_ptr.vmem [resolvable:$true] %s166_s18  ;;  %s165_s20 = int_to_ptr.hbm [resolvable:$true] %s164_s20 }
  0x1c   : > { %s154_s28 = scalar_lea.sflag [#allocation8], %s133_s25  ;;  %175 = sbr.rel (%p172_p3) target bundleno = 303 (0x12f), region = 28 }
  0x1d   : > { %436 = dma.hbm_to_vmem [thread:$0]  (!%p431_p0), %s165_s20, 128, %s167_s18, %s154_s28  }
  0x1e   : > { %s733_s19 = sand.u32 (!%p172_p3), 1, %s623_s10  }
  0x1f   : > { %s736_s29 = sshll.u32 (!%p172_p3), %s733_s19, 3  ;;  %s178_s30 = scalar_lea.sflag (!%p172_p3), [#allocation5], %s733_s19 }
  0x20   : > { %s181_s3 = scalar_lea.vmem (!%p172_p3), [#allocation4], %s736_s29 }
  0x21   : > { %606 = dma.done.wait (%p703_p8), %s178_s30, 128  }
  0x22   : > { %608 = vsyncadd (%p703_p8), %s178_s30, 4294967168  ;;  %s188_s25 = scalar_lea.sflag [#allocation8], %s733_s19  ;;  %s191_s26 = scalar_lea.vmem [#allocation7], %s736_s29 }
  0x23   : > { %610 = dma.done.wait (%p703_p8), %s188_s25, 128  }
  0x24   : > { %612 = vsyncadd (%p703_p8), %s188_s25, 4294967168  ;;  %v224_v0 = vld [vmem:[%s181_s3] sm:$0xff]  ;;  %v225_v1 = vld [vmem:[%s191_s26] sm:$0xff]  ;;  %s415_s5 = sshll.u32 %s631_s12, 3  ;;  %s217_s18 = scalar_lea.vmem [#allocation9], %s736_s29 }
  0x25   : > { %v226_v2 = vmul.f32 %v225_v1, %v224_v0  ;;  %v227_v3 = vmul.f32 %v224_v0, %v224_v0  ;;  %v228_v4 = vmul.f32 %v225_v1, %v225_v1  ;;  %s294_s8 = scalar_lea.hbm %s791_s2, %s415_s5  ;;  %s296_s20 = sshll.u32 %s217_s18, 4  ;;  %s297_s20 = int_to_ptr.vmem [resolvable:$true] %s296_s20 }
  0x26   : > { %s298_s30 = sshll.u32 %s294_s8, 4  ;;  %s284_s25 = scalar_lea.sflag [#allocation6], %s733_s19  ;;  %s299_s30 = int_to_ptr.hbm [resolvable:$true] %s298_s30 }
  0x27   : > { %242 = vadd.xlane.f32.xlu0 %v226_v2  ;;  %v229_v5 = vadd.f32 %v228_v4, %v227_v3  ;;  %s567_s26 = sshra.s32 %s299_s30, 4  ;;  %s573_s29 = scalar_lea.hbm %s791_s2, 16  ;;  %s568_s26 = int_to_ptr.hbm [resolvable:$true] %s567_s26 }
  0x28   : > { %s569_s12 = scalar_lea.hbm %s568_s26, 8  ;;  %p574_p7 = scmp.lt.s32.totalorder %s568_s26, %s791_s2 }
  0x29   : > { %p570_p4 = scmp.ne.s32.totalorder %s568_s26, %s569_s12  ;;  %p575_p8 = scmp.lt.s32.totalorder %s573_s29, %s569_s12 }
  0x2b   : > { %p571_p5 = pnand %p570_p4, %p707_p9  ;;  %p576_p10 = por %p575_p8, %p574_p7 }
  0x2d   : > { %p572_p6 = pneg %p571_p5 }
  0x2f   : > { %253 = vadd.xlane.f32.xlu0 %v229_v5  ;;  %p577_p13 = pnand %p576_p10, %p572_p6 }
  0x9a   : > { %v243_v6 = vpop.xlane.xlu0 %242 }
  0x9b   : > { %v244_v7 = vrot.slane %v243_v6, 4 }
  0x9d   : > { %v245_v8 = vadd.f32 %v244_v7, %v243_v6 }
  0x9f   : > { %v246_v9 = vrot.slane %v245_v8, 2 }
  0xa1   : > { %v247_v10 = vadd.f32 %v246_v9, %v245_v8 }
  0xa2   : > { %v254_v11 = vpop.xlane.xlu0 %253 }
  0xa3   : > { %v255_v12 = vrot.slane %v254_v11, 4  ;;  %v248_v13 = vrot.slane %v247_v10, 1 }
  0xa5   : > { %v256_v14 = vadd.f32 %v255_v12, %v254_v11  ;;  %v249_v15 = vadd.f32 %v248_v13, %v247_v10 }
  0xa7   : > { %v257_v16 = vrot.slane %v256_v14, 2  ;;  %418 = vpush %v249_v15 }
  0xa9   : > { %v258_v17 = vadd.f32 %v257_v16, %v256_v14 }
  0xab   : > { %v259_v18 = vrot.slane %v258_v17, 1 }
  0xad   : > { %v260_v19 = vadd.f32 %v259_v18, %v258_v17 }
  0xaf   : > { %420 = vpush %v260_v19 }
  0xd8   : > { %s419_s21 = spop %418 }
  0xd9   : > { %s251_s15 = sadd.f32 1.0, %s419_s21 }
  0xe0   : > { %s421_s27 = spop %420 }
  0xe1   : > { %s262_s4 = sadd.f32 1.0, %s421_s27 }
  0xe3   : > { %v263_v20 = vstv %s262_s4 }
  0xe4   : > { %491 = vrcp.f32 %v263_v20  ;;  %v275_v24 = vand.u32 2147483648, %v263_v20  ;;  %v273_v26 = vand.u32 2147483647, %v263_v20  ;;  %vm269_vm1 = vweird.f32 %v263_v20 }
  0xe6   : > { %v276_v28 = vor.u32 1.1754944e-38, %v275_v24  ;;  %vm274_vm3 = vcmp.eq.f32.partialorder %v273_v26, 8.507059e+37 }
  0xea   : > { %v492_v21 = vpop.eup %491 }
  0xeb   : > { %v265_v22 = vmul.f32 %v492_v21, %v263_v20  ;;  %vm270_vm0 = vweird.f32 %v492_v21 }
  0xec   : > { %vm271_vm2 = vmor %vm269_vm1, %vm270_vm0 }
  0xed   : > { %v266_v23 = vsub.f32 1.0, %v265_v22 }
  0xef   : > { %v267_v25 = vmul.f32 %v492_v21, %v266_v23 }
  0xf1   : > { %v268_v27 = vadd.f32 %v492_v21, %v267_v25 }
  0xf3   : > { %v272_v29 = vsel %vm271_vm2, %v492_v21, %v268_v27 }
  0xf4   : > { %v277_v30 = vsel %vm274_vm3, %v276_v28, %v272_v29 }
  0xf5   : > { %422 = vpush %v277_v30 }
 0x126   : > { %s423_s16 = spop %422 }
 0x127   : > { %s279_s28 = smul.f32 %s423_s16, %s251_s15 }
 0x129   : > { %s280_s3 = ssub.f32 1.0, %s279_s28 }
 0x12b   : > { %v281_v31 = vstv %s280_s3 }
 0x12c   : > { %282 = vst [vmem:[%s217_s18] sm:$0xff] %v281_v31 }
 0x12d   : > { %580 = shalt.err (!%p577_p13)
}
 0x12e   : > { %428 = dma.vmem_to_hbm [thread:$0]  (%p707_p9), %s297_s20, 128, %s299_s30, %s284_s25  }
 0x12f PF: > { %s310_s19 = sand.u32 1, %s619_s9   ;;  %p438_p0 = pnand %p405_p12, %p714_p11 }
 0x130   : > { %s311_s6 = scalar_lea.sflag [#allocation6], %s310_s19 }
 0x131   : > { %p439_p1 = pneg %p438_p0 }
 0x133   : > { %614 = dma.done.wait (%p439_p1), %s311_s6, 128  }
 0x134   : > { %616 = vsyncadd (%p439_p1), %s311_s6, 4294967168  ;;  %s21_s14 = sadd.s32 1, %s639_s14   ;;  %s796_s9 = smov %s623_s10 }
 0x135   : > { %p18_p2 = scmp.ge.s32.totalorder %s21_s14, 4   ;;  %s797_s10 = smov %s627_s11 }
 0x136   : > { %s798_s11 = smov %s712_s23  ;;  %s799_s12 = smov %s635_s13 }
 0x137   : > { %s800_s13 = smov %s802_s17  ;;  %20 = sbr.rel (!%p18_p2) target bundleno = 8 (0x8), region = 94 }
 0x13c   :  { %317 = vsyncpa [#allocation5], 1 }
 0x13d   :  { %319 = vsyncpa [#allocation5 + $0x1], 1 }
 0x13e   :  { %320 = vsyncpa [#allocation8], 1 }
 0x13f   :  { %322 = vsyncpa [#allocation8 + $0x1], 1 }
 0x140   :  { %323 = vsyncpa [#allocation6], 1 }
 0x141   :  { %325 = vsyncpa [#allocation6 + $0x1], 1 }

</bundles_post_ra>
